<compile_context>
chip_gen: v5e
topology: v5e:2x2
jax: 0.10.0
libtpu: 0.0.40
codegen_flags: <defaults>
</compile_context>

<pallas_src>
import jax
import jax.numpy as jnp
from jax.experimental import pallas as pl
from jax.experimental.pallas import tpu as pltpu

_LANE = 128   # TPU lane width
_SUB = 8      # f32 sublane tile


def _mlp_kernel(x_ref, p_ref, out_ref):
    x = x_ref[...]                 # (bt, D_in)  f32
    p = p_ref[...]                 # (8, 128)    packed params
    bt, d_in = x.shape
    nrow, lanes = out_ref.shape    # (bt // 128, 128)

    # ---- Layer 1: tiny-K contraction as VPU broadcast-FMAs ----------------
    # p rows 0..d_in-1 = w1, row d_in = b1 (with 1.0 at the bias-unit lane).
    # Padded lanes of h stay exactly 0; the bias-unit lane becomes exactly 1.
    h = x[:, 0:1] * p[0:1, :] + p[d_in:d_in + 1, :]
    for k in range(1, d_in):                        # static unroll, d_in tiny
        h = h + x[:, k:k + 1] * p[k:k + 1, :]
    h = jnp.maximum(h, 0.0)                         # ReLU (VPU), (bt, 128)

    # ---- Layer 2 (D_out == 1) + batch-into-lanes pack ----------------------
    # p row d_in+1 = w2 (with b2 at the bias-unit lane). One (128,128) XLU
    # transpose per 128 batch rows, then a cheap sublane reduction gives a
    # lane-dense (1, 128) row per slab (128 batch rows packed into lanes).
    g = h * p[d_in + 1:d_in + 2, :]                 # (bt, 128)
    rows = []
    for n in range(nrow):                           # static unroll, nrow <= 16
        slab = g[n * lanes:(n + 1) * lanes, :]      # (128, 128) static slice
        rows.append(jnp.sum(slab.T, axis=0, keepdims=True))   # (1, 128)
    y = rows[0] if nrow == 1 else jnp.concatenate(rows, axis=0)  # (nrow, 128)

    # ---- Sigmoid on the packed block through the EUP -----------------------
    out_ref[...] = (0.5 * (jnp.tanh(0.5 * y) + 1.0)).astype(out_ref.dtype)


def _round_up(n, m):
    return ((n + m - 1) // m) * m


def simple_nn_forward(x, w1, b1, w2t, b2, *, batch_block=2048):
    """x: (B, D_in); w1: (D_in, H); b1: (1, H) or (H,);
    w2t: (D_out, H) (PyTorch layer2.weight layout); b2: (1, D_out)."""
    B, D_in = x.shape
    D_out, H = w2t.shape
    # TODO(synk): fast path is specialised to a single sigmoid output
    # (output_size == 1), which is what the binary-classification module uses.
    assert D_out == 1, "kernel specialised to output_size == 1"
    assert D_in + 2 <= _SUB, "input_size too large for the packed param slab"
    assert H + 1 <= _LANE, "hidden_size too large for the packed param slab"

    # ---- Pack all parameters into one zero-padded (8, 128) f32 slab --------
    # rows 0..D_in-1 : w1 ; row D_in : b1 (+ 1.0 bias unit at lane H)
    # row D_in+1     : w2  (+ b2 at lane H) ; remaining rows/lanes are zero.
    p = jnp.zeros((_SUB, _LANE), jnp.float32)
    p = p.at[0:D_in, 0:H].set(w1.astype(jnp.float32))
    p = p.at[D_in, 0:H].set(b1.reshape(H).astype(jnp.float32))
    p = p.at[D_in, H].set(1.0)                                   # bias unit
    p = p.at[D_in + 1, 0:H].set(w2t.reshape(H).astype(jnp.float32))
    p = p.at[D_in + 1, H].set(b2.reshape(()).astype(jnp.float32))

    # ---- Batch tiling -------------------------------------------------------
    # Pad B to a multiple of 128 (128 batch rows pack into one output lane
    # row); amortise the ~0.35us/step fixed cost with large tiles; keep the
    # packed output block sublane-aligned (tile multiple of 1024) whenever the
    # grid has more than one step; and give large batches >= 2 grid steps so
    # the "parallel" axis can shard across v7x's two TensorCores.
    MULTI = _SUB * _LANE                    # 1024
    Bp = _round_up(B, _LANE)
    if Bp <= batch_block:
        if Bp >= 2 * MULTI:
            bt = _round_up(pl.cdiv(Bp, 2), MULTI)   # >= 2 steps (megacore)
        else:
            bt = Bp                                  # single small step
    else:
        bt = _round_up(min(batch_block, Bp), MULTI)
    Bp = _round_up(Bp, bt)
    grid = (Bp // bt,)

    xp = x.astype(jnp.float32)
    if Bp != B:
        xp = jnp.pad(xp, ((0, Bp - B), (0, 0)))     # pad rows are discarded

    out_rows = Bp // _LANE
    packed = pl.pallas_call(
        _mlp_kernel,
        out_shape=jax.ShapeDtypeStruct((out_rows, _LANE), jnp.float32),
        grid=grid,
        in_specs=[
            pl.BlockSpec((bt, D_in), lambda i: (i, 0)),
            pl.BlockSpec((_SUB, _LANE), lambda i: (0, 0)),
        ],
        out_specs=pl.BlockSpec((bt // _LANE, _LANE), lambda i: (i, 0)),
        compiler_params=pltpu.CompilerParams(
            dimension_semantics=("parallel",)),
    )(xp, p)

    # Un-pack batch-from-lanes and drop pad rows (layout plumbing only).
    return packed.reshape(Bp, 1)[:B]


def reference_forward(x, w1, b1, w2t, b2):
    h = jnp.maximum(x @ w1 + b1, 0.0)
    return jax.nn.sigmoid(h @ w2t.T + b2)


if __name__ == "__main__":
    # Shapes implied by the module: non-linearly-separable 2-D points,
    # one hidden layer, single sigmoid output.
    batch, input_size, hidden_size, output_size = 8, 2, 32, 1

    key = jax.random.PRNGKey(0)
    k_x, k_w1, k_b1, k_w2, k_b2 = jax.random.split(key, 5)

    x = jax.random.normal(k_x, (batch, input_size), dtype=jnp.float32)

    # PyTorch-Linear-like uniform(-1/sqrt(fan_in), 1/sqrt(fan_in)) init.
    bound1 = 1.0 / (input_size ** 0.5)
    w1 = jax.random.uniform(k_w1, (input_size, hidden_size), jnp.float32,
                            -bound1, bound1)
    b1 = jax.random.uniform(k_b1, (1, hidden_size), jnp.float32, -bound1, bound1)

    bound2 = 1.0 / (hidden_size ** 0.5)
    # w2t kept in PyTorch layer2.weight layout: (out_features, in_features).
    w2t = jax.random.uniform(k_w2, (output_size, hidden_size), jnp.float32,
                             -bound2, bound2)
    b2 = jax.random.uniform(k_b2, (1, output_size), jnp.float32, -bound2, bound2)

    out = simple_nn_forward(x, w1, b1, w2t, b2)
    out = jax.block_until_ready(out)

    ref = reference_forward(x, w1, b1, w2t, b2)
    assert out.shape == (batch, output_size)
    assert jnp.allclose(out, ref, atol=1e-5, rtol=1e-5)

    print("KERNEL_OK")
</pallas_src>

<mosaic_0001>
module attributes {stable_mosaic.version = 11 : i64} {
  func.func @_mlp_kernel(%arg0: i32, %arg1: memref<128x2xf32, #tpu.memory_space<vmem>>, %arg2: memref<8x128xf32, #tpu.memory_space<vmem>>, %arg3: memref<1x128xf32, #tpu.memory_space<vmem>>) attributes {dimension_semantics = [#tpu.dimension_semantics<parallel>], iteration_bounds = array<i64: 1>, scalar_prefetch = 0 : i64, scratch_operands = 0 : i64, tpu.core_type = #tpu.core_type<tc>, window_params = [{transform_indices = @transform_0, window_bounds = array<i64: 128, 2>}, {pipeline_mode = #tpu.pipeline_mode<synchronous>, transform_indices = @transform_1, window_bounds = array<i64: 8, 128>}, {transform_indices = @transform_2, window_bounds = array<i64: 1, 128>}]} {
    %c0 = arith.constant 0 : index
    %c0_0 = arith.constant 0 : index
    %0 = vector.load %arg1[%c0, %c0_0] : memref<128x2xf32, #tpu.memory_space<vmem>>, vector<128x2xf32>
    %c0_1 = arith.constant 0 : index
    %c0_2 = arith.constant 0 : index
    %1 = vector.load %arg2[%c0_1, %c0_2] : memref<8x128xf32, #tpu.memory_space<vmem>>, vector<8x128xf32>
    %2 = vector.extract_strided_slice %0 {offsets = [0, 0], sizes = [128, 1], strides = [1, 1]} : vector<128x2xf32> to vector<128x1xf32>
    %3 = vector.extract_strided_slice %1 {offsets = [0, 0], sizes = [1, 128], strides = [1, 1]} : vector<8x128xf32> to vector<1x128xf32>
    %4 = vector.broadcast %2 : vector<128x1xf32> to vector<128x128xf32>
    %5 = vector.broadcast %3 : vector<1x128xf32> to vector<128x128xf32>
    %6 = arith.mulf %4, %5 : vector<128x128xf32>
    %7 = vector.extract_strided_slice %1 {offsets = [2, 0], sizes = [1, 128], strides = [1, 1]} : vector<8x128xf32> to vector<1x128xf32>
    %8 = vector.broadcast %7 : vector<1x128xf32> to vector<128x128xf32>
    %9 = arith.addf %6, %8 : vector<128x128xf32>
    %10 = vector.extract_strided_slice %0 {offsets = [0, 1], sizes = [128, 1], strides = [1, 1]} : vector<128x2xf32> to vector<128x1xf32>
    %11 = vector.extract_strided_slice %1 {offsets = [1, 0], sizes = [1, 128], strides = [1, 1]} : vector<8x128xf32> to vector<1x128xf32>
    %12 = vector.broadcast %10 : vector<128x1xf32> to vector<128x128xf32>
    %13 = vector.broadcast %11 : vector<1x128xf32> to vector<128x128xf32>
    %14 = arith.mulf %12, %13 : vector<128x128xf32>
    %15 = arith.addf %9, %14 : vector<128x128xf32>
    %cst = arith.constant 0.000000e+00 : f32
    %16 = vector.broadcast %cst : f32 to vector<128x128xf32>
    %17 = arith.maximumf %15, %16 : vector<128x128xf32>
    %18 = vector.extract_strided_slice %1 {offsets = [3, 0], sizes = [1, 128], strides = [1, 1]} : vector<8x128xf32> to vector<1x128xf32>
    %19 = vector.broadcast %18 : vector<1x128xf32> to vector<128x128xf32>
    %20 = arith.mulf %17, %19 : vector<128x128xf32>
    %21 = tpu.transpose %20, [1, 0] : vector<128x128xf32> -> vector<128x128xf32>
    %cst_3 = arith.constant dense<0.000000e+00> : vector<128xf32>
    %22 = vector.multi_reduction <add>, %21, %cst_3 [0] : vector<128x128xf32> to vector<128xf32>
    %23 = vector.shape_cast %22 : vector<128xf32> to vector<1x128xf32>
    %cst_4 = arith.constant 5.000000e-01 : f32
    %24 = vector.broadcast %cst_4 : f32 to vector<1x128xf32>
    %25 = arith.mulf %24, %23 : vector<1x128xf32>
    %26 = math.tanh %25 : vector<1x128xf32>
    %cst_5 = arith.constant 1.000000e+00 : f32
    %27 = vector.broadcast %cst_5 : f32 to vector<1x128xf32>
    %28 = arith.addf %26, %27 : vector<1x128xf32>
    %cst_6 = arith.constant 5.000000e-01 : f32
    %29 = vector.broadcast %cst_6 : f32 to vector<1x128xf32>
    %30 = arith.mulf %29, %28 : vector<1x128xf32>
    %c0_7 = arith.constant 0 : index
    %c0_8 = arith.constant 0 : index
    %31 = vector.load %arg3[%c0_7, %c0_8] : memref<1x128xf32, #tpu.memory_space<vmem>>, vector<1x128xf32>
    tpu.vector_store %arg3[%c0_7, %c0_8], %30 {strides = array<i32>} : memref<1x128xf32, #tpu.memory_space<vmem>>, vector<1x128xf32>,
    return
  }
  func.func @transform_0(%arg0: i32) -> (i32, i32) {
    %c0_i32 = arith.constant 0 : i32
    %c0_i32_0 = arith.constant 0 : i32
    return %arg0, %c0_i32 : i32, i32
  }
  func.func @transform_1(%arg0: i32) -> (i32, i32) {
    %c0_i32 = arith.constant 0 : i32
    %c0_i32_0 = arith.constant 0 : i32
    %c0_i32_1 = arith.constant 0 : i32
    return %c0_i32, %c0_i32_0 : i32, i32
  }
  func.func @transform_2(%arg0: i32) -> (i32, i32) {
    %c0_i32 = arith.constant 0 : i32
    %c0_i32_0 = arith.constant 0 : i32
    return %arg0, %c0_i32 : i32, i32
  }
}

</mosaic_0001>

<bundles_post_ra>
// kernel: tpu_custom_call.1
= control target key start
LH: loop header
LB: loop body
LE: loop exit
PB: predicated region body
PF: predicated region fallthrough
CT: control target
= control target key end

     0   :  { %v389_v3 = vmov 0   ;;  %s542_s0 = inlined_call_operand.vmem [shape: f32[128,2], index: 0, kind: input, shape index: {}]   ;;  %s543_s1 = inlined_call_operand.vmem [shape: f32[8,128], index: 1, kind: input, shape index: {}]   ;;  %s544_s2 = inlined_call_operand.hbm [shape: f32[1,128], index: 2, kind: output, shape index: {}]  }
   0x1   :  { %v16_v0 = vld [vmem:[%s542_s0 + $0x20] sm:$0xff]  ;;  %v14_v1 = vld [vmem:[%s542_s0 + $0x10] sm:$0xff]  ;;  %352 = vset.pattern.permute.xlu2 %v389_v3  ;;  %351 = vset.pattern.permute.xlu1 %v389_v3 }
   0x2   :  { %v12_v2 = vld [vmem:[%s542_s0] sm:$0xff]  ;;  %350 = vset.pattern.permute.xlu0 %v389_v3  ;;  %51 = vperm.xlu2 %352, %v16_v0  }
   0x3   :  { %41 = vperm.xlu1 %351, %v14_v1   ;;  %31 = vperm.xlu0 %350, %v12_v2  }
   0x4   :  { %7 = vsyncpa [#allocation3], 0  ;;  %v17_v4 = vld [vmem:[%s542_s0 + $0x28] sm:$0xff]  ;;  %v15_v5 = vld [vmem:[%s542_s0 + $0x18] sm:$0xff]  ;;  %v390_v9 = vmov 1   ;;  %s338_s17 = sshll.u32 %s544_s2, 4  ;;  %s339_s17 = int_to_ptr.hbm [resolvable:$true] %s338_s17 }
   0x5   :  { %v13_v6 = vld [vmem:[%s542_s0 + $0x8] sm:$0xff]  ;;  %v20_v7 = vld [vmem:[%s542_s0 + $0x40] sm:$0xff]  ;;  %v19_v8 = vld [vmem:[%s542_s0 + $0x38] sm:$0xff] }
   0x6   :  { %v23_v10 = vld [vmem:[%s542_s0 + $0x58] sm:$0xff]  ;;  %v22_v11 = vld [vmem:[%s542_s0 + $0x50] sm:$0xff]  ;;  %v21_v13 = vld [vmem:[%s542_s0 + $0x48] sm:$0xff] }
   0x7   :  { %v18_v12 = vld [vmem:[%s542_s0 + $0x30] sm:$0xff]  ;;  %v24_v14 = vld [vmem:[%s542_s0 + $0x60] sm:$0xff]  ;;  %v25_v15 = vld [vmem:[%s542_s0 + $0x68] sm:$0xff] }
   0x8   :  { %v26_v16 = vld [vmem:[%s542_s0 + $0x70] sm:$0xff]  ;;  %v27_v17 = vld [vmem:[%s542_s0 + $0x78] sm:$0xff]  ;;  %v28_v24 = vld [vmem:[%s543_s1] sm:$0xff]  ;;  %s391_s0 = smov [#allocation2]  }
   0x9   :  { %v458_v25 = vperm.slane %v28_v24, 0  ;;  %v463_v28 = vperm.slane %v28_v24, 2  ;;  %v465_v29 = vperm.slane %v28_v24, 1  ;;  %v469_v35 = vperm.slane %v28_v24, 3  ;;  %s336_s1 = sshll.u32 %s391_s0, 4  ;;  %s337_s1 = int_to_ptr.vmem [resolvable:$true] %s336_s1 }
   0xa   :  { %56 = vperm.xlu2 %352, %v17_v4  }
   0xb   :  { %46 = vperm.xlu1 %351, %v15_v5   ;;  %36 = vperm.xlu0 %350, %v13_v6  }
  0x12   :  { %71 = vperm.xlu2 %352, %v20_v7  }
  0x13   :  { %66 = vperm.xlu1 %351, %v19_v8   ;;  %353 = vset.pattern.permute.xlu0 %v390_v9 }
  0x14   :  { %144 = vperm.xlu0 %353, %v12_v2  }
  0x1a   :  { %86 = vperm.xlu2 %352, %v23_v10  }
  0x1b   :  { %81 = vperm.xlu1 %351, %v22_v11  }
  0x1c   :  { %164 = vperm.xlu0 %353, %v17_v4  }
  0x22   :  { %355 = vset.pattern.permute.xlu2 %v390_v9 }
  0x23   :  { %354 = vset.pattern.permute.xlu1 %v390_v9  ;;  %152 = vperm.xlu2 %355, %v14_v1  }
  0x24   :  { %148 = vperm.xlu1 %354, %v13_v6   ;;  %176 = vperm.xlu0 %353, %v20_v7  }
  0x2b   :  { %160 = vperm.xlu2 %355, %v16_v0  }
  0x2c   :  { %156 = vperm.xlu1 %354, %v15_v5   ;;  %188 = vperm.xlu0 %353, %v23_v10  }
  0x33   :  { %172 = vperm.xlu2 %355, %v19_v8  }
  0x34   :  { %168 = vperm.xlu1 %354, %v18_v12   ;;  %356 = vset.pattern.permute.xlu0 %v389_v3 }
  0x35   :  { %61 = vperm.xlu0 %356, %v18_v12  }
  0x3b   :  { %184 = vperm.xlu2 %355, %v22_v11  }
  0x3c   :  { %180 = vperm.xlu1 %354, %v21_v13  }
  0x3d   :  { %76 = vperm.xlu0 %356, %v21_v13  }
  0x43   :  { %192 = vperm.xlu2 %355, %v24_v14  }
  0x44   :  { %357 = vset.pattern.permute.xlu1 %v389_v3 }
  0x45   :  { %91 = vperm.xlu1 %357, %v24_v14   ;;  %96 = vperm.xlu0 %356, %v25_v15  }
  0x4b   :  { %359 = vset.pattern.permute.xlu2 %v389_v3 }
  0x4c   :  { %101 = vperm.xlu2 %359, %v26_v16  }
  0x4d   :  { %358 = vset.pattern.permute.xlu1 %v390_v9  ;;  %360 = vset.pattern.permute.xlu0 %v390_v9 }
  0x4e   :  { %196 = vperm.xlu1 %358, %v25_v15   ;;  %204 = vperm.xlu0 %360, %v27_v17  }
  0x54   :  { %106 = vperm.xlu2 %359, %v27_v17  }
  0x56   :  { %200 = vperm.xlu1 %358, %v26_v16  }
  0x5c   :  { %v52_v18 = vpop.permute.xlu2 %51 }
  0x5d   :  { %v114_v62 = vmul.f32 %v458_v25, %v52_v18 }
  0x5f   :  { %v131_v2 = vadd.f32 %v463_v28, %v114_v62 }
  0x64   :  { %v57_v21 = vpop.permute.xlu2 %56 }
  0x65   :  { %v115_v5 = vmul.f32 %v458_v25, %v57_v21 }
  0x67   :  { %v132_v9 = vadd.f32 %v463_v28, %v115_v5 }
  0x6c   :  { %v460_v26 = vpop.permute.xlu2 %71 }
  0x74   :  { %v471_v37 = vpop.permute.xlu2 %86 }
  0x75   :  { %v42_v19 = vpop.permute.xlu1 %41  ;;  %v32_v20 = vpop.permute.xlu0 %31 }
  0x76   :  { %v110_v27 = vmul.f32 %v458_v25, %v32_v20  ;;  %v112_v44 = vmul.f32 %v458_v25, %v42_v19 }
  0x78   :  { %v127_v32 = vadd.f32 %v463_v28, %v110_v27  ;;  %v129_v49 = vadd.f32 %v463_v28, %v112_v44 }
  0x7d   :  { %v47_v22 = vpop.permute.xlu1 %46  ;;  %v37_v23 = vpop.permute.xlu0 %36 }
  0x7e   :  { %v111_v40 = vmul.f32 %v458_v25, %v37_v23  ;;  %v153_v42 = vpop.permute.xlu2 %152  ;;  %v113_v55 = vmul.f32 %v458_v25, %v47_v22 }
  0x7f   :  { %v210_v47 = vmul.f32 %v465_v29, %v153_v42 }
  0x80   :  { %v128_v45 = vadd.f32 %v463_v28, %v111_v40  ;;  %v130_v58 = vadd.f32 %v463_v28, %v113_v55 }
  0x81   :  { %v226_v51 = vadd.f32 %v210_v47, %v129_v49 }
  0x83   :  { %v242_v56 = vmax.f32 %v226_v51, 0.0 }
  0x85   :  { %v67_v30 = vpop.permute.xlu1 %66  ;;  %v259_v59 = vmul.f32 %v469_v35, %v242_v56 }
  0x86   :  { %v145_v31 = vpop.permute.xlu0 %144  ;;  %v161_v61 = vpop.permute.xlu2 %160  ;;  %v117_v20 = vmul.f32 %v458_v25, %v67_v30 }
  0x87   :  { %v208_v33 = vmul.f32 %v465_v29, %v145_v31  ;;  %v212_v0 = vmul.f32 %v465_v29, %v161_v61  ;;  %v118_v31 = vmul.f32 %v458_v25, %v460_v26 }
  0x88   :  { %v134_v23 = vadd.f32 %v463_v28, %v117_v20 }
  0x89   :  { %v224_v34 = vadd.f32 %v208_v33, %v127_v32  ;;  %v228_v3 = vadd.f32 %v212_v0, %v131_v2 }
  0x8b   :  { %v240_v36 = vmax.f32 %v224_v34, 0.0  ;;  %v244_v6 = vmax.f32 %v228_v3, 0.0 }
  0x8d   :  { %v473_v38 = vpop.permute.xlu1 %81  ;;  %v257_v39 = vmul.f32 %v469_v35, %v240_v36  ;;  %v261_v10 = vmul.f32 %v469_v35, %v244_v6  ;;  %v135_v36 = vadd.f32 %v463_v28, %v118_v31 }
  0x8e   :  { %v165_v41 = vpop.permute.xlu0 %164  ;;  %v173_v19 = vpop.permute.xlu2 %172  ;;  %v120_v47 = vmul.f32 %v458_v25, %v473_v38 }
  0x8f   :  { %273 = vxpose.xlu1.b32.start [1/16] %v257_v39, 128  ;;  %v213_v7 = vmul.f32 %v465_v29, %v165_v41  ;;  %v215_v21 = vmul.f32 %v465_v29, %v173_v19 }
  0x91   :  { %v229_v11 = vadd.f32 %v213_v7, %v132_v9  ;;  %v231_v24 = vadd.f32 %v215_v21, %v134_v23 }
  0x93   :  { %v245_v14 = vmax.f32 %v229_v11, 0.0  ;;  %v247_v32 = vmax.f32 %v231_v24, 0.0 }
  0x95   :  { %v262_v17 = vmul.f32 %v469_v35, %v245_v14  ;;  %v264_v30 = vmul.f32 %v469_v35, %v247_v32 }
  0x96   :  { %v149_v43 = vpop.permute.xlu1 %148  ;;  %v177_v53 = vpop.permute.xlu0 %176 }
  0x97   :  { %v209_v46 = vmul.f32 %v465_v29, %v149_v43  ;;  %v216_v33 = vmul.f32 %v465_v29, %v177_v53  ;;  %v121_v53 = vmul.f32 %v458_v25, %v471_v37 }
  0x99   :  { %v225_v48 = vadd.f32 %v209_v46, %v128_v45  ;;  %v232_v39 = vadd.f32 %v216_v33, %v135_v36  ;;  %v185_v46 = vpop.permute.xlu2 %184 }
  0x9b   :  { %v241_v50 = vmax.f32 %v225_v48, 0.0  ;;  %v248_v42 = vmax.f32 %v232_v39, 0.0  ;;  %v218_v48 = vmul.f32 %v465_v29, %v185_v46 }
  0x9d   :  { %v258_v52 = vmul.f32 %v469_v35, %v241_v50  ;;  %v265_v26 = vmul.f32 %v469_v35, %v248_v42  ;;  %v137_v50 = vadd.f32 %v463_v28, %v120_v47 }
  0x9e   :  { %v157_v54 = vpop.permute.xlu1 %156  ;;  %v189_v63 = vpop.permute.xlu0 %188 }
  0x9f   :  { %274 = vxpose.xlu1.b32.cont [2/16] %v258_v52, 128  ;;  %v211_v57 = vmul.f32 %v465_v29, %v157_v54  ;;  %v234_v51 = vadd.f32 %v218_v48, %v137_v50  ;;  %v219_v55 = vmul.f32 %v465_v29, %v189_v63 }
  0xa1   :  { %v227_v60 = vadd.f32 %v211_v57, %v130_v58  ;;  %v250_v54 = vmax.f32 %v234_v51, 0.0  ;;  %v138_v57 = vadd.f32 %v463_v28, %v121_v53 }
  0xa3   :  { %v243_v1 = vmax.f32 %v227_v60, 0.0  ;;  %v267_v38 = vmul.f32 %v469_v35, %v250_v54  ;;  %v235_v58 = vadd.f32 %v219_v55, %v138_v57  ;;  %v193_v60 = vpop.permute.xlu2 %192 }
  0xa4   :  { %v220_v0 = vmul.f32 %v465_v29, %v193_v60 }
  0xa5   :  { %v260_v4 = vmul.f32 %v469_v35, %v243_v1  ;;  %v251_v61 = vmax.f32 %v235_v58, 0.0 }
  0xa6   :  { %v169_v13 = vpop.permute.xlu1 %168 }
  0xa7   :  { %275 = vxpose.xlu1.b32.cont [3/16] %v259_v59, 128  ;;  %v62_v8 = vpop.permute.xlu0 %61  ;;  %v214_v16 = vmul.f32 %v465_v29, %v169_v13  ;;  %v268_v1 = vmul.f32 %v469_v35, %v251_v61 }
  0xa8   :  { %v116_v12 = vmul.f32 %v458_v25, %v62_v8 }
  0xaa   :  { %v133_v15 = vadd.f32 %v463_v28, %v116_v12 }
  0xab   :  { %v102_v6 = vpop.permute.xlu2 %101 }
  0xac   :  { %v230_v18 = vadd.f32 %v214_v16, %v133_v15 }
  0xae   :  { %v246_v22 = vmax.f32 %v230_v18, 0.0  ;;  %v181_v41 = vpop.permute.xlu1 %180 }
  0xaf   :  { %276 = vxpose.xlu1.b32.cont [4/16] %v260_v4, 128  ;;  %v77_v34 = vpop.permute.xlu0 %76  ;;  %v217_v44 = vmul.f32 %v465_v29, %v181_v41 }
  0xb0   :  { %v263_v27 = vmul.f32 %v469_v35, %v246_v22  ;;  %v119_v40 = vmul.f32 %v458_v25, %v77_v34 }
  0xb2   :  { %v136_v43 = vadd.f32 %v463_v28, %v119_v40 }
  0xb3   :  { %v107_v15 = vpop.permute.xlu2 %106 }
  0xb4   :  { %v233_v45 = vadd.f32 %v217_v44, %v136_v43  ;;  %v125_v18 = vmul.f32 %v458_v25, %v107_v15 }
  0xb6   :  { %v249_v49 = vmax.f32 %v233_v45, 0.0  ;;  %v142_v21 = vadd.f32 %v463_v28, %v125_v18 }
  0xb7   :  { %277 = vxpose.xlu1.b32.cont [5/16] %v261_v10, 128  ;;  %v92_v56 = vpop.permute.xlu1 %91  ;;  %v97_v37 = vpop.permute.xlu0 %96  ;;  %v124_v10 = vmul.f32 %v458_v25, %v102_v6 }
  0xb8   :  { %v266_v52 = vmul.f32 %v469_v35, %v249_v49  ;;  %v122_v59 = vmul.f32 %v458_v25, %v92_v56  ;;  %v123_v3 = vmul.f32 %v458_v25, %v97_v37 }
  0xb9   :  { %v141_v13 = vadd.f32 %v463_v28, %v124_v10 }
  0xba   :  { %v139_v62 = vadd.f32 %v463_v28, %v122_v59  ;;  %v140_v7 = vadd.f32 %v463_v28, %v123_v3 }
  0xbc   :  { %v236_v2 = vadd.f32 %v220_v0, %v139_v62 }
  0xbe   :  { %v252_v4 = vmax.f32 %v236_v2, 0.0 }
  0xbf   :  { %278 = vxpose.xlu1.b32.cont [6/16] %v262_v17, 128 }
  0xc0   :  { %v197_v63 = vpop.permute.xlu1 %196  ;;  %v269_v8 = vmul.f32 %v469_v35, %v252_v4  ;;  %v205_v19 = vpop.permute.xlu0 %204 }
  0xc1   :  { %v221_v5 = vmul.f32 %v465_v29, %v197_v63  ;;  %v223_v22 = vmul.f32 %v465_v29, %v205_v19 }
  0xc3   :  { %v237_v9 = vadd.f32 %v221_v5, %v140_v7  ;;  %v239_v24 = vadd.f32 %v223_v22, %v142_v21 }
  0xc5   :  { %v253_v12 = vmax.f32 %v237_v9, 0.0 }
  0xc7   :  { %279 = vxpose.xlu1.b32.cont [7/16] %v263_v27, 128  ;;  %v270_v16 = vmul.f32 %v469_v35, %v253_v12  ;;  %v255_v27 = vmax.f32 %v239_v24, 0.0 }
  0xc8   :  { %v201_v11 = vpop.permute.xlu1 %200 }
  0xc9   :  { %v222_v14 = vmul.f32 %v465_v29, %v201_v11  ;;  %v272_v31 = vmul.f32 %v469_v35, %v255_v27 }
  0xcb   :  { %v238_v17 = vadd.f32 %v222_v14, %v141_v13 }
  0xcd   :  { %v254_v20 = vmax.f32 %v238_v17, 0.0 }
  0xcf   :  { %280 = vxpose.xlu1.b32.cont [8/16] %v264_v30, 128  ;;  %v271_v23 = vmul.f32 %v469_v35, %v254_v20 }
  0xd7   :  { %281 = vxpose.xlu1.b32.cont [9/16] %v265_v26, 128 }
  0xdf   :  { %282 = vxpose.xlu1.b32.cont [10/16] %v266_v52, 128 }
  0xe7   :  { %283 = vxpose.xlu1.b32.cont [11/16] %v267_v38, 128 }
  0xef   :  { %284 = vxpose.xlu1.b32.cont [12/16] %v268_v1, 128 }
  0xf7   :  { %285 = vxpose.xlu1.b32.cont [13/16] %v269_v8, 128 }
  0xff   :  { %286 = vxpose.xlu1.b32.cont [14/16] %v270_v16, 128 }
 0x107   :  { %287 = vxpose.xlu1.b32.cont [15/16] %v271_v23, 128 }
 0x10f   :  { %288 = vxpose.xlu1.b32.end [16/16] %v272_v31, 128 }
 0x13b   :  { %v289_v32 = vpop.trf.xlu1 }
 0x143   :  { %v290_v33 = vpop.trf.xlu1 }
 0x144   :  { %v305_v34 = vadd.f32 %v290_v33, %v289_v32 }
 0x14b   :  { %v291_v36 = vpop.trf.xlu1 }
 0x14c   :  { %v306_v25 = vadd.f32 %v305_v34, %v291_v36 }
 0x153   :  { %v292_v30 = vpop.trf.xlu1 }
 0x154   :  { %v307_v39 = vadd.f32 %v306_v25, %v292_v30 }
 0x15b   :  { %v293_v40 = vpop.trf.xlu1 }
 0x15c   :  { %v308_v41 = vadd.f32 %v307_v39, %v293_v40 }
 0x163   :  { %v294_v28 = vpop.trf.xlu1 }
 0x164   :  { %v309_v47 = vadd.f32 %v308_v41, %v294_v28 }
 0x16b   :  { %v295_v42 = vpop.trf.xlu1 }
 0x16c   :  { %v310_v35 = vadd.f32 %v309_v47, %v295_v42 }
 0x173   :  { %v296_v29 = vpop.trf.xlu1 }
 0x174   :  { %v311_v49 = vadd.f32 %v310_v35, %v296_v29 }
 0x17b   :  { %v297_v43 = vpop.trf.xlu1 }
 0x17c   :  { %v312_v50 = vadd.f32 %v311_v49, %v297_v43 }
 0x183   :  { %v298_v44 = vpop.trf.xlu1 }
 0x184   :  { %v313_v51 = vadd.f32 %v312_v50, %v298_v44 }
 0x18b   :  { %v299_v26 = vpop.trf.xlu1 }
 0x18c   :  { %v314_v52 = vadd.f32 %v313_v51, %v299_v26 }
 0x193   :  { %v300_v45 = vpop.trf.xlu1 }
 0x194   :  { %v315_v54 = vadd.f32 %v314_v52, %v300_v45 }
 0x19b   :  { %v301_v46 = vpop.trf.xlu1 }
 0x19c   :  { %v316_v55 = vadd.f32 %v315_v54, %v301_v46 }
 0x1a3   :  { %v302_v48 = vpop.trf.xlu1 }
 0x1a4   :  { %v317_v56 = vadd.f32 %v316_v55, %v302_v48 }
 0x1ab   :  { %v303_v53 = vpop.trf.xlu1 }
 0x1ac   :  { %v318_v57 = vadd.f32 %v317_v56, %v303_v53 }
 0x1b3   :  { %v304_v38 = vpop.trf.xlu1 }
 0x1b4   :  { %v319_v58 = vadd.f32 %v318_v57, %v304_v38 }
 0x1b6   :  { %v320_v59 = vrot.slane %v319_v58, 4 }
 0x1b8   :  { %v321_v60 = vadd.f32 %v320_v59, %v319_v58 }
 0x1ba   :  { %v322_v61 = vrot.slane %v321_v60, 2 }
 0x1bc   :  { %v323_v62 = vadd.f32 %v322_v61, %v321_v60 }
 0x1be   :  { %v324_v0 = vrot.slane %v323_v62, 1 }
 0x1c0   :  { %v325_v37 = vadd.f32 %v324_v0, %v323_v62 }
 0x1c2   :  { %v326_v1 = vmul.f32 0.5, %v325_v37 }
 0x1c4   :  { %361 = vtanh.f32 %v326_v1 }
 0x1ca   :  { %v362_v2 = vpop.eup %361 }
 0x1cb   :  { %v328_v63 = vadd.f32 1.0, %v362_v2 }
 0x1cd   :  { %v329_v3 = vmul.f32 0.5, %v328_v63 }
 0x1cf   :  { %330 = vst [vmem:[#allocation2] sm:$0x1] %v329_v3 }
 0x1d0   :  { %341 = dma.vmem_to_hbm [thread:$0]  %s337_s1, 16, %s339_s17, [#allocation3]  }
 0x1d1   :  { %387 = dma.done.wait [#allocation3], 16  }
 0x1d2   :  { %388 = vsyncadd [#allocation3], 4294967280 }
 0x1d3   :  { %346 = vsyncpa [#allocation3], 1 }

</bundles_post_ra>
